<compile_context>
chip_gen: v7x
topology: tpu7x:2x2x1
jax: 0.10.0
libtpu: 0.0.40
codegen_flags: <defaults>
</compile_context>

<pallas_src>
import functools

import jax
import jax.numpy as jnp
from jax.experimental import pallas as pl
from jax.experimental.pallas import tpu as pltpu


def _round_up(x, m):
    return ((x + m - 1) // m) * m


# --------------------------------------------------------------------------------------
# One-time capability probe: does this JAX build accept pipeline_mode=pl.Buffered(1)
# on a constant-index (resident) operand?  Keeps the kernel compiling on builds that
# reject it while still claiming the VMEM saving where available.
# --------------------------------------------------------------------------------------
_BUFFERED_SUPPORTED = None


def _single_buffer_supported():
    global _BUFFERED_SUPPORTED
    if _BUFFERED_SUPPORTED is None:
        try:
            def _probe_kernel(x_ref, w_ref, o_ref):
                o_ref[...] = x_ref[...] + w_ref[...]

            y = pl.pallas_call(
                _probe_kernel,
                out_shape=jax.ShapeDtypeStruct((16, 128), jnp.float32),
                grid=(2,),
                in_specs=[
                    pl.BlockSpec((8, 128), lambda i: (i, 0)),
                    pl.BlockSpec((8, 128), lambda i: (0, 0),
                                 pipeline_mode=pl.Buffered(buffer_count=1)),
                ],
                out_specs=pl.BlockSpec((8, 128), lambda i: (i, 0)),
            )(jnp.zeros((16, 128), jnp.float32), jnp.ones((8, 128), jnp.float32))
            jax.block_until_ready(y)
            _BUFFERED_SUPPORTED = bool(jnp.all(y == 1.0))
        except Exception:  # unsupported kwarg / lowering rejection -> default buffering
            _BUFFERED_SUPPORTED = False
    return _BUFFERED_SUPPORTED


def _compare_mlp_kernel(x_ref, a_ref, w1t_ref, w1b_ref, b1_ref, w2_ref, b2_ref, o_ref):
    """Fused g(cat([x, a], -1)) = relu(relu(x@W1t + a@W1b + b1) @ W2 + b2) on one row tile."""
    # First layer: concat folded into split weights; MXU matmuls, f32 accumulation.
    h = jnp.dot(x_ref[...], w1t_ref[...], preferred_element_type=jnp.float32)
    h = h + jnp.dot(a_ref[...], w1b_ref[...], preferred_element_type=jnp.float32)
    h = jnp.maximum(h + b1_ref[...], 0.0)          # bias + ReLU in f32 (v5e-safe)
    # Second layer: feed the MXU in the weight dtype (bf16 fast path), accumulate f32.
    # (Intentional activation-precision reduction when inputs are bf16; mirrored in the
    #  pure-JAX reference below.  For f32 activations h stays f32.)
    h = h.astype(w2_ref.dtype)
    y = jnp.dot(h, w2_ref[...], preferred_element_type=jnp.float32)
    y = jnp.maximum(y + b2_ref[...], 0.0)
    o_ref[...] = y.astype(o_ref.dtype)


def compare_mlp_pallas(x, aligned, w1, b1, w2, b2, *, tile_m=1024,
                       single_buffer_weights=False):
    """x, aligned: (M, E).  w1: (2E, H), b1: (1, H), w2: (H, H), b2: (1, H) -> (M, H)."""
    M, E = x.shape
    H = w1.shape[1]
    assert w1.shape[0] == 2 * E, "W1 rows must equal 2*embed (concat of x and aligned)"

    # --- lane-dense hidden/output dim: pad H up to a multiple of 128 --------------
    Hp = max(_round_up(H, 128), 128)
    if Hp != H:
        w1 = jnp.pad(w1, ((0, 0), (0, Hp - H)))
        b1 = jnp.pad(b1, ((0, 0), (0, Hp - H)))
        w2 = jnp.pad(w2, ((0, Hp - H), (0, Hp - H)))
        b2 = jnp.pad(b2, ((0, 0), (0, Hp - H)))

    # Split W1 so the feature-dim concat never materializes in HBM.
    w1_top, w1_bot = w1[:E], w1[E:]

    # Biases act on the f32 accumulator -> keep them f32 regardless of weight dtype.
    b1 = b1.astype(jnp.float32)
    b2 = b2.astype(jnp.float32)

    # --- device-aware VMEM budget (64 MiB/TC on v7x, 128 MiB on v5e/v6e) ------------
    try:
        vmem_cap = int(pltpu.get_tpu_info().vmem_capacity_bytes)
    except Exception:
        vmem_cap = 128 << 20
    vmem_budget = int(vmem_cap * 0.85)

    # --- row tiling: big MXU/DMA-friendly tiles, NO tail padding --------------------
    tile_m = max(128, _round_up(min(int(tile_m), M), 128))
    if M > 128:
        # Keep >= 2 grid steps so dimension_semantics=("parallel",) can shard rows
        # across v7x's two TensorCores (negligible cost on v5e/v6e).
        tile_m = min(tile_m, max(128, _round_up(pl.cdiv(M, 2), 128)))

    act_bytes = jnp.dtype(x.dtype).itemsize
    w_bytes = jnp.dtype(w1.dtype).itemsize
    n_wbuf = 1 if single_buffer_weights else 2

    def vmem_est(tm):
        return (2 * tm * (2 * E + Hp) * act_bytes            # double-buffered x/aligned/out tiles
                + n_wbuf * (2 * E * Hp + Hp * Hp) * w_bytes   # resident weights
                + n_wbuf * 2 * Hp * 4                         # resident biases (f32)
                + 2 * tm * Hp * 4)                            # f32 intermediates h and y

    # Shrink the row tile if the (1.5x-padded) estimate would exceed the device budget.
    while tile_m > 128 and int(1.5 * vmem_est(tile_m)) > vmem_budget:
        tile_m -= 128

    grid = (pl.cdiv(M, tile_m),)
    vmem_limit = int(min(vmem_budget, max(32 << 20, int(1.5 * vmem_est(tile_m)))))

    cost = pl.CostEstimate(
        flops=2 * M * (2 * E * Hp + Hp * Hp),
        transcendentals=0,
        bytes_accessed=((x.size + aligned.size + M * Hp) * act_bytes
                        + (w1_top.size + w1_bot.size + w2.size) * w_bytes
                        + (b1.size + b2.size) * 4),
    )

    # Resident operands are never re-fetched; single-buffer them when supported.
    wkw = dict(pipeline_mode=pl.Buffered(buffer_count=1)) if single_buffer_weights else {}

    out = pl.pallas_call(
        _compare_mlp_kernel,
        out_shape=jax.ShapeDtypeStruct((M, Hp), x.dtype),
        grid_spec=pltpu.PrefetchScalarGridSpec(
            num_scalar_prefetch=0,
            grid=grid,
            in_specs=[
                pl.BlockSpec((tile_m, E), lambda i: (i, 0)),       # x rows (tiled)
                pl.BlockSpec((tile_m, E), lambda i: (i, 0)),       # aligned rows (tiled)
                pl.BlockSpec((E, Hp), lambda i: (0, 0), **wkw),    # W1_top (resident)
                pl.BlockSpec((E, Hp), lambda i: (0, 0), **wkw),    # W1_bot (resident)
                pl.BlockSpec((1, Hp), lambda i: (0, 0), **wkw),    # b1
                pl.BlockSpec((Hp, Hp), lambda i: (0, 0), **wkw),   # W2 (resident)
                pl.BlockSpec((1, Hp), lambda i: (0, 0), **wkw),    # b2
            ],
            out_specs=pl.BlockSpec((tile_m, Hp), lambda i: (i, 0)),
        ),
        compiler_params=pltpu.CompilerParams(
            dimension_semantics=("parallel",),
            vmem_limit_bytes=vmem_limit,
        ),
        cost_estimate=cost,
    )(x, aligned, w1_top, w1_bot, b1, w2, b2)

    # Padded hidden columns are exact zeros; slice only when the module contract needs H.
    return out if Hp == H else out[:, :H]


def init_compare_params(key, num_inputs, num_hiddens, dtype=jnp.float32):
    """Deterministic parameter init matching mlp(num_inputs, num_hiddens) shapes."""
    k1, k2, k3, k4 = jax.random.split(key, 4)
    s1 = 1.0 / jnp.sqrt(num_inputs)
    s2 = 1.0 / jnp.sqrt(num_hiddens)
    return {
        "w1": (jax.random.uniform(k1, (num_inputs, num_hiddens), dtype) * 2 - 1) * s1,
        "b1": (jax.random.uniform(k2, (1, num_hiddens), dtype) * 2 - 1) * s1,
        "w2": (jax.random.uniform(k3, (num_hiddens, num_hiddens), dtype) * 2 - 1) * s2,
        "b2": (jax.random.uniform(k4, (1, num_hiddens), dtype) * 2 - 1) * s2,
    }


@functools.partial(jax.jit, static_argnames=("single_buffer_weights",))
def _compare_forward_impl(A, B, beta, alpha, params, *, single_buffer_weights):
    cdt = A.dtype
    w1 = params["w1"].astype(cdt)      # matmul inputs at activation dtype (bf16 MXU path)
    w2 = params["w2"].astype(cdt)
    b1 = params["b1"]
    b2 = params["b2"]

    bsz, seq_a, E = A.shape
    seq_b = B.shape[1]
    H = params["w1"].shape[1]

    # One pallas_call per g() invocation: no wrapper-side row concatenate, no tail pad,
    # no output row slices -> activations stream exactly once through HBM.
    V_A = compare_mlp_pallas(A.reshape(bsz * seq_a, E), beta.reshape(bsz * seq_a, E),
                             w1, b1, w2, b2,
                             single_buffer_weights=single_buffer_weights)
    V_B = compare_mlp_pallas(B.reshape(bsz * seq_b, E), alpha.reshape(bsz * seq_b, E),
                             w1, b1, w2, b2,
                             single_buffer_weights=single_buffer_weights)
    return V_A.reshape(bsz, seq_a, H), V_B.reshape(bsz, seq_b, H)


def compare_forward(A, B, beta, alpha, params):
    """
    A:     (batch, seq_A, embed)   premise tokens
    beta:  (batch, seq_A, embed)   hypothesis softly aligned to A
    B:     (batch, seq_B, embed)   hypothesis tokens
    alpha: (batch, seq_B, embed)   premise softly aligned to B
    returns (V_A, V_B) with trailing dim num_hiddens.
    """
    return _compare_forward_impl(A, B, beta, alpha, params,
                                 single_buffer_weights=_single_buffer_supported())


def _reference_forward(A, B, beta, alpha, params):
    """Pure-JAX reference mirroring the kernel's bf16-input / f32-accumulate precision."""
    cdt = A.dtype
    w1 = params["w1"].astype(cdt).astype(jnp.float32)
    w2 = params["w2"].astype(cdt).astype(jnp.float32)
    b1 = params["b1"].astype(jnp.float32)
    b2 = params["b2"].astype(jnp.float32)

    def g(x):
        x = x.astype(jnp.float32)
        h = jnp.maximum(x @ w1 + b1, 0.0)
        h = h.astype(cdt).astype(jnp.float32)   # mirror the kernel's cast before 2nd matmul
        return jnp.maximum(h @ w2 + b2, 0.0)

    return (g(jnp.concatenate([A, beta], axis=2)),
            g(jnp.concatenate([B, alpha], axis=2)))


if __name__ == "__main__":
    batch, seq_a, seq_b, embed = 2, 8, 12, 16
    num_inputs = 2 * embed          # concat along feature dim
    num_hiddens = 32

    key = jax.random.PRNGKey(0)
    k_p, k_a, k_b, k_be, k_al = jax.random.split(key, 5)

    params = init_compare_params(k_p, num_inputs, num_hiddens, dtype=jnp.float32)

    act_dtype = jnp.bfloat16
    A = jax.random.normal(k_a, (batch, seq_a, embed), jnp.float32).astype(act_dtype)
    B = jax.random.normal(k_b, (batch, seq_b, embed), jnp.float32).astype(act_dtype)
    beta = jax.random.normal(k_be, (batch, seq_a, embed), jnp.float32).astype(act_dtype)
    alpha = jax.random.normal(k_al, (batch, seq_b, embed), jnp.float32).astype(act_dtype)

    V_A, V_B = compare_forward(A, B, beta, alpha, params)
    jax.block_until_ready((V_A, V_B))

    # correctness check against pure-JAX reference (same bf16 rounding, f32 accumulation)
    rA, rB = _reference_forward(A, B, beta, alpha, params)
    assert V_A.shape == (batch, seq_a, num_hiddens)
    assert V_B.shape == (batch, seq_b, num_hiddens)
    assert jnp.allclose(V_A.astype(jnp.float32), rA, atol=2e-2, rtol=2e-2), "V_A mismatch"
    assert jnp.allclose(V_B.astype(jnp.float32), rB, atol=2e-2, rtol=2e-2), "V_B mismatch"

    print("KERNEL_OK")
</pallas_src>

<mosaic_0001>
module attributes {stable_mosaic.version = 11 : i64} {
  func.func @_probe_kernel(%arg0: i32, %arg1: memref<8x128xf32, #tpu.memory_space<vmem>>, %arg2: memref<8x128xf32, #tpu.memory_space<vmem>>, %arg3: memref<8x128xf32, #tpu.memory_space<vmem>>) attributes {dimension_semantics = [#tpu.dimension_semantics<arbitrary>], iteration_bounds = array<i64: 2>, scalar_prefetch = 0 : i64, scratch_operands = 0 : i64, tpu.core_type = #tpu.core_type<tc>, window_params = [{transform_indices = @transform_0, window_bounds = array<i64: 8, 128>}, {pipeline_mode = #tpu.pipeline_mode<synchronous>, transform_indices = @transform_1, window_bounds = array<i64: 8, 128>}, {transform_indices = @transform_2, window_bounds = array<i64: 8, 128>}]} {
    %c0 = arith.constant 0 : index
    %c0_0 = arith.constant 0 : index
    %0 = vector.load %arg1[%c0, %c0_0] : memref<8x128xf32, #tpu.memory_space<vmem>>, vector<8x128xf32>
    %c0_1 = arith.constant 0 : index
    %c0_2 = arith.constant 0 : index
    %1 = vector.load %arg2[%c0_1, %c0_2] : memref<8x128xf32, #tpu.memory_space<vmem>>, vector<8x128xf32>
    %2 = arith.addf %0, %1 : vector<8x128xf32>
    %c0_3 = arith.constant 0 : index
    %c0_4 = arith.constant 0 : index
    %3 = vector.load %arg3[%c0_3, %c0_4] : memref<8x128xf32, #tpu.memory_space<vmem>>, vector<8x128xf32>
    tpu.vector_store %arg3[%c0_3, %c0_4], %2 {strides = array<i32>} : memref<8x128xf32, #tpu.memory_space<vmem>>, vector<8x128xf32>,
    return
  }
  func.func @transform_0(%arg0: i32) -> (i32, i32) {
    %c0_i32 = arith.constant 0 : i32
    %c0_i32_0 = arith.constant 0 : i32
    return %arg0, %c0_i32 : i32, i32
  }
  func.func @transform_1(%arg0: i32) -> (i32, i32) {
    %c0_i32 = arith.constant 0 : i32
    %c0_i32_0 = arith.constant 0 : i32
    %c0_i32_1 = arith.constant 0 : i32
    return %c0_i32, %c0_i32_0 : i32, i32
  }
  func.func @transform_2(%arg0: i32) -> (i32, i32) {
    %c0_i32 = arith.constant 0 : i32
    %c0_i32_0 = arith.constant 0 : i32
    return %arg0, %c0_i32 : i32, i32
  }
}

module attributes {stable_mosaic.version = 11 : i64} {
  func.func @_compare_mlp_kernel(%arg0: i32, %arg1: memref<128x16xbf16, #tpu.memory_space<vmem>>, %arg2: memref<128x16xbf16, #tpu.memory_space<vmem>>, %arg3: memref<16x128xbf16, #tpu.memory_space<vmem>>, %arg4: memref<16x128xbf16, #tpu.memory_space<vmem>>, %arg5: memref<1x128xf32, #tpu.memory_space<vmem>>, %arg6: memref<128x128xbf16, #tpu.memory_space<vmem>>, %arg7: memref<1x128xf32, #tpu.memory_space<vmem>>, %arg8: memref<128x128xbf16, #tpu.memory_space<vmem>>) attributes {dimension_semantics = [#tpu.dimension_semantics<parallel>], iteration_bounds = array<i64: 1>, scalar_prefetch = 0 : i64, scratch_operands = 0 : i64, tpu.core_type = #tpu.core_type<tc>, window_params = [{transform_indices = @transform_0, window_bounds = array<i64: 128, 16>}, {transform_indices = @transform_1, window_bounds = array<i64: 128, 16>}, {pipeline_mode = #tpu.pipeline_mode<synchronous>, transform_indices = @transform_2, window_bounds = array<i64: 16, 128>}, {pipeline_mode = #tpu.pipeline_mode<synchronous>, transform_indices = @transform_3, window_bounds = array<i64: 16, 128>}, {pipeline_mode = #tpu.pipeline_mode<synchronous>, transform_indices = @transform_4, window_bounds = array<i64: 1, 128>}, {pipeline_mode = #tpu.pipeline_mode<synchronous>, transform_indices = @transform_5, window_bounds = array<i64: 128, 128>}, {pipeline_mode = #tpu.pipeline_mode<synchronous>, transform_indices = @transform_6, window_bounds = array<i64: 1, 128>}, {transform_indices = @transform_7, window_bounds = array<i64: 128, 128>}]} {
    %c0 = arith.constant 0 : index
    %c0_0 = arith.constant 0 : index
    %0 = vector.load %arg1[%c0, %c0_0] : memref<128x16xbf16, #tpu.memory_space<vmem>>, vector<128x16xbf16>
    %c0_1 = arith.constant 0 : index
    %c0_2 = arith.constant 0 : index
    %1 = vector.load %arg3[%c0_1, %c0_2] : memref<16x128xbf16, #tpu.memory_space<vmem>>, vector<16x128xbf16>
    %cst = arith.constant dense<0.000000e+00> : vector<128x128xf32>
    %2 = tpu.matmul %0, %1, %cst {dimension_numbers = #tpu.dot_dimension_numbers<[1], [0], [0], [1], [0, 0, 1, 1], [], []>} : vector<128x16xbf16>, vector<16x128xbf16>, vector<128x128xf32> -> vector<128x128xf32>
    %c0_3 = arith.constant 0 : index
    %c0_4 = arith.constant 0 : index
    %3 = vector.load %arg2[%c0_3, %c0_4] : memref<128x16xbf16, #tpu.memory_space<vmem>>, vector<128x16xbf16>
    %c0_5 = arith.constant 0 : index
    %c0_6 = arith.constant 0 : index
    %4 = vector.load %arg4[%c0_5, %c0_6] : memref<16x128xbf16, #tpu.memory_space<vmem>>, vector<16x128xbf16>
    %cst_7 = arith.constant dense<0.000000e+00> : vector<128x128xf32>
    %5 = tpu.matmul %3, %4, %cst_7 {dimension_numbers = #tpu.dot_dimension_numbers<[1], [0], [0], [1], [0, 0, 1, 1], [], []>} : vector<128x16xbf16>, vector<16x128xbf16>, vector<128x128xf32> -> vector<128x128xf32>
    %6 = arith.addf %2, %5 : vector<128x128xf32>
    %c0_8 = arith.constant 0 : index
    %c0_9 = arith.constant 0 : index
    %7 = vector.load %arg5[%c0_8, %c0_9] : memref<1x128xf32, #tpu.memory_space<vmem>>, vector<1x128xf32>
    %8 = vector.broadcast %7 : vector<1x128xf32> to vector<128x128xf32>
    %9 = arith.addf %6, %8 : vector<128x128xf32>
    %cst_10 = arith.constant 0.000000e+00 : f32
    %10 = vector.broadcast %cst_10 : f32 to vector<128x128xf32>
    %11 = arith.maximumf %9, %10 : vector<128x128xf32>
    %12 = arith.truncf %11 : vector<128x128xf32> to vector<128x128xbf16>
    %c0_11 = arith.constant 0 : index
    %c0_12 = arith.constant 0 : index
    %13 = vector.load %arg6[%c0_11, %c0_12] : memref<128x128xbf16, #tpu.memory_space<vmem>>, vector<128x128xbf16>
    %cst_13 = arith.constant dense<0.000000e+00> : vector<128x128xf32>
    %14 = tpu.matmul %12, %13, %cst_13 {dimension_numbers = #tpu.dot_dimension_numbers<[1], [0], [0], [1], [0, 0, 1, 1], [], []>} : vector<128x128xbf16>, vector<128x128xbf16>, vector<128x128xf32> -> vector<128x128xf32>
    %c0_14 = arith.constant 0 : index
    %c0_15 = arith.constant 0 : index
    %15 = vector.load %arg7[%c0_14, %c0_15] : memref<1x128xf32, #tpu.memory_space<vmem>>, vector<1x128xf32>
    %16 = vector.broadcast %15 : vector<1x128xf32> to vector<128x128xf32>
    %17 = arith.addf %14, %16 : vector<128x128xf32>
    %cst_16 = arith.constant 0.000000e+00 : f32
    %18 = vector.broadcast %cst_16 : f32 to vector<128x128xf32>
    %19 = arith.maximumf %17, %18 : vector<128x128xf32>
    %20 = arith.truncf %19 : vector<128x128xf32> to vector<128x128xbf16>
    %c0_17 = arith.constant 0 : index
    %c0_18 = arith.constant 0 : index
    %21 = vector.load %arg8[%c0_17, %c0_18] : memref<128x128xbf16, #tpu.memory_space<vmem>>, vector<128x128xbf16>
    tpu.vector_store %arg8[%c0_17, %c0_18], %20 {strides = array<i32>} : memref<128x128xbf16, #tpu.memory_space<vmem>>, vector<128x128xbf16>,
    return
  }
  func.func @transform_0(%arg0: i32) -> (i32, i32) {
    %c0_i32 = arith.constant 0 : i32
    %c0_i32_0 = arith.constant 0 : i32
    return %arg0, %c0_i32 : i32, i32
  }
  func.func @transform_1(%arg0: i32) -> (i32, i32) {
    %c0_i32 = arith.constant 0 : i32
    %c0_i32_0 = arith.constant 0 : i32
    return %arg0, %c0_i32 : i32, i32
  }
  func.func @transform_2(%arg0: i32) -> (i32, i32) {
    %c0_i32 = arith.constant 0 : i32
    %c0_i32_0 = arith.constant 0 : i32
    %c0_i32_1 = arith.constant 0 : i32
    return %c0_i32, %c0_i32_0 : i32, i32
  }
  func.func @transform_3(%arg0: i32) -> (i32, i32) {
    %c0_i32 = arith.constant 0 : i32
    %c0_i32_0 = arith.constant 0 : i32
    %c0_i32_1 = arith.constant 0 : i32
    return %c0_i32, %c0_i32_0 : i32, i32
  }
  func.func @transform_4(%arg0: i32) -> (i32, i32) {
    %c0_i32 = arith.constant 0 : i32
    %c0_i32_0 = arith.constant 0 : i32
    %c0_i32_1 = arith.constant 0 : i32
    return %c0_i32, %c0_i32_0 : i32, i32
  }
  func.func @transform_5(%arg0: i32) -> (i32, i32) {
    %c0_i32 = arith.constant 0 : i32
    %c0_i32_0 = arith.constant 0 : i32
    %c0_i32_1 = arith.constant 0 : i32
    return %c0_i32, %c0_i32_0 : i32, i32
  }
  func.func @transform_6(%arg0: i32) -> (i32, i32) {
    %c0_i32 = arith.constant 0 : i32
    %c0_i32_0 = arith.constant 0 : i32
    %c0_i32_1 = arith.constant 0 : i32
    return %c0_i32, %c0_i32_0 : i32, i32
  }
  func.func @transform_7(%arg0: i32) -> (i32, i32) {
    %c0_i32 = arith.constant 0 : i32
    %c0_i32_0 = arith.constant 0 : i32
    return %arg0, %c0_i32 : i32, i32
  }
}

module attributes {stable_mosaic.version = 11 : i64} {
  func.func @_compare_mlp_kernel(%arg0: i32, %arg1: memref<128x16xbf16, #tpu.memory_space<vmem>>, %arg2: memref<128x16xbf16, #tpu.memory_space<vmem>>, %arg3: memref<16x128xbf16, #tpu.memory_space<vmem>>, %arg4: memref<16x128xbf16, #tpu.memory_space<vmem>>, %arg5: memref<1x128xf32, #tpu.memory_space<vmem>>, %arg6: memref<128x128xbf16, #tpu.memory_space<vmem>>, %arg7: memref<1x128xf32, #tpu.memory_space<vmem>>, %arg8: memref<128x128xbf16, #tpu.memory_space<vmem>>) attributes {dimension_semantics = [#tpu.dimension_semantics<parallel>], iteration_bounds = array<i64: 1>, scalar_prefetch = 0 : i64, scratch_operands = 0 : i64, tpu.core_type = #tpu.core_type<tc>, window_params = [{transform_indices = @transform_0, window_bounds = array<i64: 128, 16>}, {transform_indices = @transform_1, window_bounds = array<i64: 128, 16>}, {pipeline_mode = #tpu.pipeline_mode<synchronous>, transform_indices = @transform_2, window_bounds = array<i64: 16, 128>}, {pipeline_mode = #tpu.pipeline_mode<synchronous>, transform_indices = @transform_3, window_bounds = array<i64: 16, 128>}, {pipeline_mode = #tpu.pipeline_mode<synchronous>, transform_indices = @transform_4, window_bounds = array<i64: 1, 128>}, {pipeline_mode = #tpu.pipeline_mode<synchronous>, transform_indices = @transform_5, window_bounds = array<i64: 128, 128>}, {pipeline_mode = #tpu.pipeline_mode<synchronous>, transform_indices = @transform_6, window_bounds = array<i64: 1, 128>}, {transform_indices = @transform_7, window_bounds = array<i64: 128, 128>}]} {
    %c0 = arith.constant 0 : index
    %c0_0 = arith.constant 0 : index
    %0 = vector.load %arg1[%c0, %c0_0] : memref<128x16xbf16, #tpu.memory_space<vmem>>, vector<128x16xbf16>
    %c0_1 = arith.constant 0 : index
    %c0_2 = arith.constant 0 : index
    %1 = vector.load %arg3[%c0_1, %c0_2] : memref<16x128xbf16, #tpu.memory_space<vmem>>, vector<16x128xbf16>
    %cst = arith.constant dense<0.000000e+00> : vector<128x128xf32>
    %2 = tpu.matmul %0, %1, %cst {dimension_numbers = #tpu.dot_dimension_numbers<[1], [0], [0], [1], [0, 0, 1, 1], [], []>} : vector<128x16xbf16>, vector<16x128xbf16>, vector<128x128xf32> -> vector<128x128xf32>
    %c0_3 = arith.constant 0 : index
    %c0_4 = arith.constant 0 : index
    %3 = vector.load %arg2[%c0_3, %c0_4] : memref<128x16xbf16, #tpu.memory_space<vmem>>, vector<128x16xbf16>
    %c0_5 = arith.constant 0 : index
    %c0_6 = arith.constant 0 : index
    %4 = vector.load %arg4[%c0_5, %c0_6] : memref<16x128xbf16, #tpu.memory_space<vmem>>, vector<16x128xbf16>
    %cst_7 = arith.constant dense<0.000000e+00> : vector<128x128xf32>
    %5 = tpu.matmul %3, %4, %cst_7 {dimension_numbers = #tpu.dot_dimension_numbers<[1], [0], [0], [1], [0, 0, 1, 1], [], []>} : vector<128x16xbf16>, vector<16x128xbf16>, vector<128x128xf32> -> vector<128x128xf32>
    %6 = arith.addf %2, %5 : vector<128x128xf32>
    %c0_8 = arith.constant 0 : index
    %c0_9 = arith.constant 0 : index
    %7 = vector.load %arg5[%c0_8, %c0_9] : memref<1x128xf32, #tpu.memory_space<vmem>>, vector<1x128xf32>
    %8 = vector.broadcast %7 : vector<1x128xf32> to vector<128x128xf32>
    %9 = arith.addf %6, %8 : vector<128x128xf32>
    %cst_10 = arith.constant 0.000000e+00 : f32
    %10 = vector.broadcast %cst_10 : f32 to vector<128x128xf32>
    %11 = arith.maximumf %9, %10 : vector<128x128xf32>
    %12 = arith.truncf %11 : vector<128x128xf32> to vector<128x128xbf16>
    %c0_11 = arith.constant 0 : index
    %c0_12 = arith.constant 0 : index
    %13 = vector.load %arg6[%c0_11, %c0_12] : memref<128x128xbf16, #tpu.memory_space<vmem>>, vector<128x128xbf16>
    %cst_13 = arith.constant dense<0.000000e+00> : vector<128x128xf32>
    %14 = tpu.matmul %12, %13, %cst_13 {dimension_numbers = #tpu.dot_dimension_numbers<[1], [0], [0], [1], [0, 0, 1, 1], [], []>} : vector<128x128xbf16>, vector<128x128xbf16>, vector<128x128xf32> -> vector<128x128xf32>
    %c0_14 = arith.constant 0 : index
    %c0_15 = arith.constant 0 : index
    %15 = vector.load %arg7[%c0_14, %c0_15] : memref<1x128xf32, #tpu.memory_space<vmem>>, vector<1x128xf32>
    %16 = vector.broadcast %15 : vector<1x128xf32> to vector<128x128xf32>
    %17 = arith.addf %14, %16 : vector<128x128xf32>
    %cst_16 = arith.constant 0.000000e+00 : f32
    %18 = vector.broadcast %cst_16 : f32 to vector<128x128xf32>
    %19 = arith.maximumf %17, %18 : vector<128x128xf32>
    %20 = arith.truncf %19 : vector<128x128xf32> to vector<128x128xbf16>
    %c0_17 = arith.constant 0 : index
    %c0_18 = arith.constant 0 : index
    %21 = vector.load %arg8[%c0_17, %c0_18] : memref<128x128xbf16, #tpu.memory_space<vmem>>, vector<128x128xbf16>
    tpu.vector_store %arg8[%c0_17, %c0_18], %20 {strides = array<i32>} : memref<128x128xbf16, #tpu.memory_space<vmem>>, vector<128x128xbf16>,
    return
  }
  func.func @transform_0(%arg0: i32) -> (i32, i32) {
    %c0_i32 = arith.constant 0 : i32
    %c0_i32_0 = arith.constant 0 : i32
    return %arg0, %c0_i32 : i32, i32
  }
  func.func @transform_1(%arg0: i32) -> (i32, i32) {
    %c0_i32 = arith.constant 0 : i32
    %c0_i32_0 = arith.constant 0 : i32
    return %arg0, %c0_i32 : i32, i32
  }
  func.func @transform_2(%arg0: i32) -> (i32, i32) {
    %c0_i32 = arith.constant 0 : i32
    %c0_i32_0 = arith.constant 0 : i32
    %c0_i32_1 = arith.constant 0 : i32
    return %c0_i32, %c0_i32_0 : i32, i32
  }
  func.func @transform_3(%arg0: i32) -> (i32, i32) {
    %c0_i32 = arith.constant 0 : i32
    %c0_i32_0 = arith.constant 0 : i32
    %c0_i32_1 = arith.constant 0 : i32
    return %c0_i32, %c0_i32_0 : i32, i32
  }
  func.func @transform_4(%arg0: i32) -> (i32, i32) {
    %c0_i32 = arith.constant 0 : i32
    %c0_i32_0 = arith.constant 0 : i32
    %c0_i32_1 = arith.constant 0 : i32
    return %c0_i32, %c0_i32_0 : i32, i32
  }
  func.func @transform_5(%arg0: i32) -> (i32, i32) {
    %c0_i32 = arith.constant 0 : i32
    %c0_i32_0 = arith.constant 0 : i32
    %c0_i32_1 = arith.constant 0 : i32
    return %c0_i32, %c0_i32_0 : i32, i32
  }
  func.func @transform_6(%arg0: i32) -> (i32, i32) {
    %c0_i32 = arith.constant 0 : i32
    %c0_i32_0 = arith.constant 0 : i32
    %c0_i32_1 = arith.constant 0 : i32
    return %c0_i32, %c0_i32_0 : i32, i32
  }
  func.func @transform_7(%arg0: i32) -> (i32, i32) {
    %c0_i32 = arith.constant 0 : i32
    %c0_i32_0 = arith.constant 0 : i32
    return %arg0, %c0_i32 : i32, i32
  }
}

</mosaic_0001>

<bundles_post_ra>
// kernel: tpu_custom_call.1
= control target key start
LH: loop header
LB: loop body
LE: loop exit
PB: predicated region body
PF: predicated region fallthrough
CT: control target
= control target key end

     0   :  { %7 = vsyncpa [#allocation3], 0  ;;  %s690_s0 = inlined_call_operand.hbm [shape: f32[16,128], index: 0, kind: input, shape index: {}]   ;;  %s691_s1 = inlined_call_operand.hbm [shape: f32[8,128], index: 1, kind: input, shape index: {}]   ;;  %s692_s2 = inlined_call_operand.hbm [shape: f32[16,128], index: 2, kind: output, shape index: {}]  }
   0x1   :  { %9 = vsyncpa [#allocation3 + $0x1], 0 }
   0x2   :  { %10 = vsyncpa [#allocation6], 0 }
   0x3   :  { %11 = vsyncpa [#allocation4], 0 }
   0x4   :  { %13 = vsyncpa [#allocation4 + $0x1], 0  ;;  %s489_s9 = smov 0   ;;  %s491_s10 = smov 0  }
   0x5   :  { %s493_s11 = smov 0   ;;  %s495_s12 = smov 0  }
   0x6 LB: > { %s510_s13 = sadd.s32 4294967295, %s469_s12   ;;  %s270_s14 = sadd.s32 4294967294, %s469_s12   ;;  %s469_s12 = sphi %s495_s12, %s716_s12   ;;  %s465_s11 = sphi %s493_s11, %s715_s11   ;;  %s461_s10 = sphi %s491_s10, %s714_s10   ;;  %s457_s9 = sphi %s489_s9, %s713_s9  }
   0x7   : > { %p39_p0 = scmp.ne.s32.totalorder %s461_s10, %s457_s9  ;;  %p693_p1 = scmp.eq.s32.totalorder %s510_s13, 0 }
   0x8   : > { %p90_p3 = scmp.eq.s32.totalorder %s270_s14, 1  ;;  %p271_p5 = scmp.ge.s32.totalorder %s469_s12, 1 }
   0x9   : > { %p519_p4 = por %p693_p1, %p39_p0  ;;  %p97_p7 = scmp.lt.s32.totalorder %s469_s12, 3 }
   0xa   : > { %p524_p6 = por %p90_p3, %p39_p0  ;;  %s471_s18 = smov [#allocation5]  }
   0xb   : > { %s696_s15 = scalar_select %p519_p4, 1, 0 }
   0xc   : > { %s697_s16 = scalar_select %p524_p6, 1, 0 }
   0xd   : > { %p529_p8 = pnand %p271_p5, %p97_p7  ;;  %s110_s19 = sshll.u32 %s471_s18, 4  ;;  %s111_s19 = int_to_ptr.vmem [resolvable:$true] %s110_s19 }
   0xe   : > { %s537_s20 = sadd.s32 1, %s469_s12   ;;  %s26_s24 = sadd.s32 1, %s465_s11 }
   0xf   : > { %s698_s17 = scalar_select %p529_p8, 1, 0 }
  0x10   : > { %p292_p10 = pneg %p529_p8  ;;  %s23_s22 = ssub.s32 %s469_s12, %s537_s20 }
  0x11   : > { %p547_p12 = scmp.eq.s32.totalorder %s23_s22, 0  ;;  %s341_s27 = scalar_lea.hbm %s691_s1, 128 }
  0x12   : > { %p541_p11 = pnand %p292_p10, %p693_p1  ;;  %p342_p0 = scmp.ne.s32.totalorder %s691_s1, %s341_s27 }
  0x13   : > { %s700_s23 = scalar_select %p547_p12, 1, 0 }
  0x14   : > { %p343_p3 = pneg %p541_p11  ;;  %p348_p10 = scmp.lt.u32.totalorder %s341_s27, %s691_s1 }
  0x16   : > { %p344_p5 = pnand %p343_p3, %p342_p0 }
  0x18   : > { %p345_p7 = pneg %p344_p5 }
  0x1a   : > { %p350_p9 = pnand %p348_p10, %p345_p7 }
  0x1c   : > { %353 = shalt.err (!%p350_p9)
}
  0x1d   : > { %s354_s4 = scalar_lea.vmem %s111_s19, 128  ;;  %p362_p6 = scmp.lt.s32.totalorder %s111_s19, %s111_s19 }
  0x1e   : > { %p355_p1 = scmp.ne.s32.totalorder %s111_s19, %s354_s4  ;;  %p363_p4 = scmp.lt.s32.totalorder %s354_s4, %s354_s4 }
  0x20   : > { %p357_p2 = pnand %p355_p1, %p343_p3  ;;  %p364_p8 = por %p363_p4, %p362_p6 }
  0x22   : > { %p358_p13 = pneg %p357_p2 }
  0x24   : > { %p365_p12 = pnand %p364_p8, %p358_p13 }
  0x26   : > { %368 = shalt.err (!%p365_p12)
}
  0x27   : > { %295 = dma.hbm_to_vmem [thread:$0]  (!%p541_p11), %s691_s1, 128, %s111_s19, [#allocation6]  }
  0x28   : > { %p701_p1 = scmp.ne.s32.totalorder %s700_s23, 0  ;;  %p34_p2 = scmp.eq.s32.totalorder %s469_s12, 0 }
  0x29   : > { %p702_p4 = scmp.ne.s32.totalorder %s465_s11, %s461_s10  ;;  %p703_p6 = scmp.eq.s32.totalorder %s510_s13, 1 }
  0x2a   : > { %s573_s7 = scalar_select %p701_p1, %s465_s11, %s26_s24  }
  0x2b   : > { %p581_p8 = por %p703_p6, %p702_p4  ;;  %p305_p9 = scmp.lt.s32.totalorder %s469_s12, 2 }
  0x2c   : > { %s121_s14 = sand.u32 1, %s465_s11   ;;  %p705_p12 = pmov %p702_p4 }
  0x2d   : > { %s274_s18 = sshll.u32 %s121_s14, 3  ;;  %s275_s21 = sshll.u32 %s469_s12, 7 }
  0x2e   : > { %p35_p13 = por %p34_p2, %p705_p12  ;;  %s594_s19 = scalar_lea.hbm %s690_s0, %s275_s21 }
  0x2f   : > { %s125_s23 = scalar_lea.vmem [#allocation2], %s274_s18  ;;  %s122_s27 = scalar_lea.sflag [#allocation3], %s121_s14 }
  0x30   : > { %s132_s24 = sshll.u32 %s125_s23, 4  ;;  %p596_p11 = pnand %p305_p9, %p35_p13  ;;  %s600_s24 = int_to_ptr.vmem [resolvable:$true] %s132_s24 }
  0x31   : > { %s369_s28 = scalar_lea.hbm %s594_s19, 128  ;;  %s374_s3 = scalar_lea.hbm %s690_s0, 256 }
  0x32   : > { %p370_p0 = scmp.ne.s32.totalorder %s594_s19, %s369_s28  ;;  %p371_p3 = pneg %p596_p11 }
  0x33   : > { %p375_p10 = scmp.lt.u32.totalorder %s594_s19, %s690_s0  ;;  %p376_p1 = scmp.lt.u32.totalorder %s374_s3, %s369_s28 }
  0x34   : > { %p372_p5 = pnand %p371_p3, %p370_p0  ;;  %p378_p4 = scmp.lt.u32.totalorder %s369_s28, %s594_s19 }
  0x35   : > { %p377_p2 = por %p376_p1, %p375_p10 }
  0x36   : > { %p373_p7 = pneg %p372_p5 }
  0x37   : > { %p379_p6 = por %p378_p4, %p377_p2 }
  0x39   : > { %p380_p9 = pnand %p379_p6, %p373_p7 }
  0x3b   : > { %383 = shalt.err (!%p380_p9)
}
  0x3c   : > { %s384_s6 = scalar_lea.vmem %s600_s24, 128  ;;  %s472_s14 = smov [#allocation2]  }
  0x3d   : > { %p385_p12 = scmp.ne.s32.totalorder %s600_s24, %s384_s6  ;;  %s389_s18 = sshll.u32 %s472_s14, 4  ;;  %s390_s18 = int_to_ptr.vmem [resolvable:$false] %s389_s18 }
  0x3e   : > { %s391_s21 = scalar_lea.vmem %s390_s18, 256  ;;  %p392_p5 = scmp.lt.s32.totalorder %s600_s24, %s390_s18 }
  0x3f   : > { %p387_p13 = pnand %p385_p12, %p371_p3  ;;  %p393_p10 = scmp.lt.s32.totalorder %s391_s21, %s384_s6 }
  0x41   : > { %p388_p0 = pneg %p387_p13  ;;  %p394_p1 = por %p393_p10, %p392_p5 }
  0x43   : > { %p395_p2 = pnand %p394_p1, %p388_p0 }
  0x45   : > { %398 = shalt.err (!%p395_p2)
}
  0x46   : > { %299 = dma.hbm_to_vmem [thread:$0]  (!%p596_p11), %s594_s19, 128, %s600_s24, %s122_s27  }
  0x47   : > { %p707_p7 = scmp.ne.s32.totalorder %s698_s17, 0 }
  0x48   : > { %s630_s22 = sand.u32 (!%p707_p7), 1, %s461_s10   ;;  %p708_p3 = scmp.ne.s32.totalorder (!%p707_p7), %s696_s15, 0 }
  0x49   : > { %141 = sbr.rel (%p707_p7) target bundleno = 109 (0x6d), region = 28  ;;  %s277_s25 = sshll.u32 (!%p707_p7), %s630_s22, 3 }
  0x4a   : > { %s144_s23 = scalar_lea.sflag (!%p707_p7), [#allocation3], %s630_s22  ;;  %s147_s28 = scalar_lea.vmem (!%p707_p7), [#allocation2], %s277_s25 }
  0x50   : > { %444 = dma.done.wait (%p708_p3), %s144_s23, 128  }
  0x51   : > { %446 = vsyncadd (%p708_p3), %s144_s23, 4294967168  ;;  %p709_p4 = scmp.eq.s32.totalorder %s510_s13, 0 }
  0x53   : > { %448 = dma.done.wait (%p709_p4), [#allocation6], 128   ;;  %p710_p11 = pmov %p709_p4 }
  0x54   : > { %s171_s17 = scalar_lea.vmem [#allocation7], %s277_s25  ;;  %s281_s24 = sshll.u32 %s510_s13, 7  ;;  %v172_v0 = vld [vmem:[%s147_s28] sm:$0xff]  ;;  %v173_v1 = vld [vmem:[#allocation5] sm:$0xff] }
  0x55   : > { %450 = vsyncadd (%p710_p11), [#allocation6], 4294967168  ;;  %s190_s19 = sshll.u32 %s171_s17, 4  ;;  %v174_v2 = vadd.f32 %v173_v1, %v172_v0  ;;  %s648_s27 = scalar_lea.hbm %s692_s2, %s281_s24  ;;  %s643_s19 = int_to_ptr.vmem [resolvable:$true] %s190_s19 }
  0x56   : > { %s177_s29 = scalar_lea.sflag [#allocation4], %s630_s22  ;;  %s399_s30 = scalar_lea.vmem %s643_s19, 128 }
  0x57   : > { %175 = vst [vmem:[%s171_s17] sm:$0xff] %v174_v2  ;;  %p400_p6 = scmp.ne.s32.totalorder %s643_s19, %s399_s30  ;;  %s473_s13 = smov [#allocation7]  }
  0x58   : > { %s403_s3 = sshll.u32 %s473_s13, 4  ;;  %s404_s3 = int_to_ptr.vmem [resolvable:$false] %s403_s3 }
  0x59   : > { %p401_p9 = pnand %p400_p6, %p581_p8  ;;  %s405_s4 = scalar_lea.vmem %s404_s3, 256 }
  0x5a   : > { %p406_p13 = scmp.lt.s32.totalorder %s643_s19, %s404_s3  ;;  %p407_p0 = scmp.lt.s32.totalorder %s405_s4, %s399_s30 }
  0x5b   : > { %p402_p12 = pneg %p401_p9 }
  0x5c   : > { %p408_p5 = por %p407_p0, %p406_p13 }
  0x5e   : > { %p409_p10 = pnand %p408_p5, %p402_p12 }
  0x60   : > { %412 = shalt.err (!%p409_p10)
}
  0x61   : > { %s413_s5 = scalar_lea.hbm %s648_s27, 128  ;;  %s417_s18 = scalar_lea.hbm %s692_s2, 256 }
  0x62   : > { %p414_p1 = scmp.ne.s32.totalorder %s648_s27, %s413_s5  ;;  %p418_p3 = scmp.lt.u32.totalorder %s648_s27, %s692_s2 }
  0x63   : > { %p419_p4 = scmp.lt.u32.totalorder %s417_s18, %s413_s5  ;;  %p421_p6 = scmp.lt.u32.totalorder %s413_s5, %s648_s27 }
  0x64   : > { %p415_p2 = pnand %p414_p1, %p581_p8 }
  0x65   : > { %p420_p11 = por %p419_p4, %p418_p3 }
  0x66   : > { %p416_p7 = pneg %p415_p2 }
  0x67   : > { %p422_p9 = por %p421_p6, %p420_p11 }
  0x69   : > { %p423_p12 = pnand %p422_p9, %p416_p7 }
  0x6b   : > { %426 = shalt.err (!%p423_p12)
}
  0x6c   : > { %290 = dma.vmem_to_hbm [thread:$0]  (%p581_p8), %s643_s19, 128, %s648_s27, %s177_s29  }
  0x6d PF: > { %s202_s25 = sand.u32 1, %s457_s9   ;;  %p711_p13 = scmp.ne.s32.totalorder %s697_s16, 0 }
  0x6e   : > { %p712_p0 = scmp.ge.s32.totalorder %s469_s12, 2  ;;  %s203_s23 = scalar_lea.sflag [#allocation4], %s202_s25 }
  0x70   : > { %p301_p5 = pnand %p712_p0, %p711_p13 }
  0x72   : > { %452 = dma.done.wait (!%p301_p5), %s203_s23, 128  }
  0x73   : > { %454 = vsyncadd (!%p301_p5), %s203_s23, 4294967168  ;;  %p16_p10 = scmp.ge.s32.totalorder %s537_s20, 4   ;;  %s713_s9 = smov %s461_s10 }
  0x74   : > { %s714_s10 = smov %s465_s11  ;;  %s715_s11 = smov %s573_s7 }
  0x75   : > { %s716_s12 = smov %s537_s20  ;;  %18 = sbr.rel (!%p16_p10) target bundleno = 6 (0x6), region = 77 }
  0x7c   :  { %208 = vsyncpa [#allocation3], 1 }
  0x7d   :  { %210 = vsyncpa [#allocation3 + $0x1], 1 }
  0x7e   :  { %211 = vsyncpa [#allocation6], 1 }
  0x7f   :  { %212 = vsyncpa [#allocation4], 1 }
  0x80   :  { %214 = vsyncpa [#allocation4 + $0x1], 1 }

// kernel: _compare_forward_impl.2
= control target key start
LH: loop header
LB: loop body
LE: loop exit
PB: predicated region body
PF: predicated region fallthrough
CT: control target
= control target key end

     0   :  { %vm109_vm0 = vcmask 130048   ;;  %s1170_s0 = inlined_call_operand.vmem [shape: bf16[16,16], index: 0, kind: input, shape index: {}]   ;;  %s1171_s1 = inlined_call_operand.vmem [shape: bf16[16,16], index: 1, kind: input, shape index: {}]   ;;  %s1172_s2 = inlined_call_operand.vmem [shape: bf16[16,128], index: 2, kind: input, shape index: {}]   ;;  %s1173_s3 = inlined_call_operand.vmem [shape: bf16[16,128], index: 3, kind: input, shape index: {}]   ;;  %s1174_s4 = inlined_call_operand.vmem [shape: f32[1,128], index: 4, kind: input, shape index: {}]   ;;  %s1175_s5 = inlined_call_operand.vmem [shape: bf16[128,128], index: 5, kind: input, shape index: {}]   ;;  %s1176_s6 = inlined_call_operand.vmem [shape: f32[1,128], index: 6, kind: input, shape index: {}]   ;;  %s1177_s7 = inlined_call_operand.vmem [shape: bf16[16,128], index: 7, kind: output, shape index: {}]  }
   0x1   :  { %v1001_v0 = vld [vmem:[%s1173_s3] sm:$0xff]   ;;  %v1003_v2 = vld [vmem:[%s1171_s1 + $0x8] sm:$0xff]   ;;  %v1005_v4 = vld [vmem:[%s1171_s1 + $0x10] sm:$0xff]  }
   0x2   :  { %v1002_v1 = vld [vmem:[%s1171_s1] sm:$0xff]   ;;  %917 = vmatprep.subr.bf16.mxu0 %v1001_v0  ;;  %v1006_v5 = vld [vmem:[%s1171_s1 + $0x18] sm:$0xff]   ;;  %v1008_v7 = vld [vmem:[%s1171_s1 + $0x28] sm:$0xff]  }
   0x3   :  { %918 = vmatpush3.bf16.msra.mxu0 %v1001_v0  ;;  %919 = vmatprep.mubr.msk.bf16.mxu0 %vm109_vm0, %v1002_v1  ;;  %v1004_v3 = vld [vmem:[%s1172_s2] sm:$0xff]   ;;  %v1009_v8 = vld [vmem:[%s1171_s1 + $0x30] sm:$0xff]   ;;  %v1020_v10 = vld [vmem:[%s1175_s5 + $0x8] sm:$0xff]  }
   0x4   :  { %935 = vmatprep.subr.bf16.mxu0 %v1004_v3  ;;  %v1007_v6 = vld [vmem:[%s1171_s1 + $0x20] sm:$0xff]   ;;  %v1021_v11 = vld [vmem:[%s1175_s5 + $0x10] sm:$0xff]   ;;  %v1010_v12 = vld [vmem:[%s1171_s1 + $0x38] sm:$0xff]  }
   0x5   :  { %v1019_v9 = vld [vmem:[%s1175_s5] sm:$0xff]   ;;  %v1022_v13 = vld [vmem:[%s1175_s5 + $0x18] sm:$0xff]   ;;  %v1012_v16 = vld [vmem:[%s1170_s0 + $0x8] sm:$0xff]  }
   0x6   :  { %920 = vmatmul.mubr.msk.bf16.vlgmr.msra.gmra.mrb[0].mxu0 %vm109_vm0, %v1003_v2  ;;  %953 = vmatprep.subr.bf16.mxu1 %v1019_v9  ;;  %v1011_v14 = vld [vmem:[%s1170_s0] sm:$0xff]   ;;  %v1024_v17 = vld [vmem:[%s1175_s5 + $0x28] sm:$0xff]   ;;  %v1013_v18 = vld [vmem:[%s1170_s0 + $0x10] sm:$0xff]  }
   0x7   :  { %936 = vmatpush3.bf16.msra.mxu0 %v1004_v3  ;;  %923 = vmatprep.mubr.msk.bf16.mxu0 %vm109_vm0, %v1005_v4  ;;  %v1023_v15 = vld [vmem:[%s1175_s5 + $0x20] sm:$0xff]   ;;  %v1014_v19 = vld [vmem:[%s1170_s0 + $0x18] sm:$0xff]   ;;  %v1016_v21 = vld [vmem:[%s1170_s0 + $0x28] sm:$0xff]  }
   0x8   :  { %954 = vmatpush3.bf16.msra.mxu1 %v1019_v9  ;;  %v1015_v20 = vld [vmem:[%s1170_s0 + $0x20] sm:$0xff]   ;;  %v1017_v22 = vld [vmem:[%s1170_s0 + $0x30] sm:$0xff]   ;;  %v1018_v23 = vld [vmem:[%s1170_s0 + $0x38] sm:$0xff]  }
   0x9   :  { %955 = vmatprep.subr.bf16.mxu1 %v1020_v10  ;;  %v1025_v24 = vld [vmem:[%s1175_s5 + $0x30] sm:$0xff]   ;;  %v1026_v25 = vld [vmem:[%s1175_s5 + $0x38] sm:$0xff]   ;;  %v794_v26 = vld [vmem:[%s1174_s4] ss:$0 sm:$0xff] }
   0xc   :  { %956 = vmatpush3.bf16.msra.mxu1 %v1020_v10 }
   0xd   :  { %957 = vmatprep.subr.bf16.mxu1 %v1021_v11 }
   0xe   :  { %924 = vmatmul.mubr.msk.bf16.gmra.mrb[4].mxu0 %vm109_vm0, %v1006_v5 }
   0xf   :  { %927 = vmatprep.mubr.msk.bf16.mxu0 %vm109_vm0, %v1007_v6 }
  0x10   :  { %958 = vmatpush3.bf16.msra.mxu1 %v1021_v11 }
  0x11   :  { %959 = vmatprep.subr.bf16.mxu1 %v1022_v13 }
  0x14   :  { %960 = vmatpush3.bf16.msra.mxu1 %v1022_v13 }
  0x15   :  { %961 = vmatprep.subr.bf16.mxu1 %v1023_v15 }
  0x16   :  { %928 = vmatmul.mubr.msk.bf16.gmra.mrb[8].mxu0 %vm109_vm0, %v1008_v7 }
  0x17   :  { %931 = vmatprep.mubr.msk.bf16.mxu0 %vm109_vm0, %v1009_v8 }
  0x18   :  { %962 = vmatpush3.bf16.msra.mxu1 %v1023_v15 }
  0x19   :  { %963 = vmatprep.subr.bf16.mxu1 %v1024_v17 }
  0x1c   :  { %964 = vmatpush3.bf16.msra.mxu1 %v1024_v17 }
  0x1d   :  { %965 = vmatprep.subr.bf16.mxu1 %v1025_v24 }
  0x1e   :  { %932 = vmatmul.mubr.msk.bf16.gmra.mrb[12].mxu0 %vm109_vm0, %v1010_v12 }
  0x1f   :  { %937 = vmatprep.mubr.msk.bf16.mxu0 %vm109_vm0, %v1011_v14 }
  0x20   :  { %966 = vmatpush3.bf16.msra.mxu1 %v1025_v24 }
  0x21   :  { %967 = vmatprep.subr.bf16.mxu1 %v1026_v25 }
  0x24   :  { %968 = vmatpush3.bf16.msra.mxu1 %v1026_v25 }
  0x26   :  { %938 = vmatmul.mubr.msk.bf16.vlgmr.msra.gmra.mrb[0].mxu0 %vm109_vm0, %v1012_v16 }
  0x27   :  { %941 = vmatprep.mubr.msk.bf16.mxu0 %vm109_vm0, %v1013_v18 }
  0x2e   :  { %942 = vmatmul.mubr.msk.bf16.gmra.mrb[4].mxu0 %vm109_vm0, %v1014_v19  ;;  %v795_v19 = vld [vmem:[%s1176_s6] ss:$0 sm:$0xff] }
  0x2f   :  { %945 = vmatprep.mubr.msk.bf16.mxu0 %vm109_vm0, %v1015_v20 }
  0x36   :  { %946 = vmatmul.mubr.msk.bf16.gmra.mrb[8].mxu0 %vm109_vm0, %v1016_v21 }
  0x37   :  { %949 = vmatprep.mubr.msk.bf16.mxu0 %vm109_vm0, %v1017_v22 }
  0x3e   :  { %950 = vmatmul.mubr.msk.bf16.gmra.mrb[12].mxu0 %vm109_vm0, %v1018_v23 }
  0xf9   :  { %v939_v27 = vpop.f32.mrb[0].mxu0 }
  0xfa   :  { %v407_v28 = vadd.f32 %v939_v27, %v794_v26  ;;  %v335_v29 = vpop.f32.mrb[1].mxu0 }
  0xfb   :  { %v405_v30 = vadd.f32 %v794_v26, %v335_v29  ;;  %v940_v31 = vpop.f32.mrb[2].mxu0 }
  0xfc   :  { %v408_v32 = vadd.f32 %v940_v31, %v794_v26  ;;  %v338_v33 = vpop.f32.mrb[3].mxu0  ;;  %v423_v35 = vmax.f32 %v407_v28, 0.0 }
  0xfd   :  { %v406_v34 = vadd.f32 %v794_v26, %v338_v33  ;;  %v421_v37 = vmax.f32 %v405_v30, 0.0 }
  0xfe   :  { %v424_v36 = vmax.f32 %v408_v32, 0.0 }
  0xff   :  { %v422_v38 = vmax.f32 %v406_v34, 0.0 }
 0x100   :  { %v438_v39 = vpack.c.bf16 %v424_v36, %v423_v35 }
 0x101   :  { %v943_v40 = vpop.f32.mrb[4].mxu0  ;;  %v437_v41 = vpack.c.bf16 %v422_v38, %v421_v37 }
 0x102   :  { %v411_v42 = vadd.f32 %v943_v40, %v794_v26  ;;  %v351_v43 = vpop.f32.mrb[5].mxu0 }
 0x103   :  { %v409_v44 = vadd.f32 %v794_v26, %v351_v43  ;;  %v944_v45 = vpop.f32.mrb[6].mxu0  ;;  %969 = vmatprep.mubr.bf16.mxu1 %v437_v41 }
 0x104   :  { %v412_v46 = vadd.f32 %v944_v45, %v794_v26  ;;  %v354_v47 = vpop.f32.mrb[7].mxu0  ;;  %970 = vmatmul.mubr.bf16.vlgmr.msra.gmra.mrb[0].mxu1 %v438_v39  ;;  %v427_v49 = vmax.f32 %v411_v42, 0.0 }
 0x105   :  { %v410_v48 = vadd.f32 %v794_v26, %v354_v47  ;;  %v425_v51 = vmax.f32 %v409_v44, 0.0 }
 0x106   :  { %v428_v50 = vmax.f32 %v412_v46, 0.0 }
 0x107   :  { %v426_v52 = vmax.f32 %v410_v48, 0.0 }
 0x108   :  { %v440_v53 = vpack.c.bf16 %v428_v50, %v427_v49 }
 0x109   :  { %v439_v54 = vpack.c.bf16 %v426_v52, %v425_v51  ;;  %v947_v55 = vpop.f32.mrb[8].mxu0 }
 0x10a   :  { %v415_v56 = vadd.f32 %v947_v55, %v794_v26  ;;  %v367_v57 = vpop.f32.mrb[9].mxu0 }
 0x10b   :  { %v413_v58 = vadd.f32 %v794_v26, %v367_v57  ;;  %v948_v59 = vpop.f32.mrb[10].mxu0  ;;  %973 = vmatprep.mubr.bf16.mxu1 %v439_v54 }
 0x10c   :  { %v416_v60 = vadd.f32 %v948_v59, %v794_v26  ;;  %v370_v61 = vpop.f32.mrb[11].mxu0  ;;  %974 = vmatmul.mubr.bf16.gmra.mrb[4].mxu1 %v440_v53  ;;  %v431_v63 = vmax.f32 %v415_v56, 0.0 }
 0x10d   :  { %v414_v62 = vadd.f32 %v794_v26, %v370_v61  ;;  %v429_v1 = vmax.f32 %v413_v58, 0.0 }
 0x10e   :  { %v432_v0 = vmax.f32 %v416_v60, 0.0 }
 0x10f   :  { %v430_v2 = vmax.f32 %v414_v62, 0.0 }
 0x110   :  { %v442_v3 = vpack.c.bf16 %v432_v0, %v431_v63 }
 0x111   :  { %v441_v4 = vpack.c.bf16 %v430_v2, %v429_v1  ;;  %v951_v5 = vpop.f32.mrb[12].mxu0 }
 0x112   :  { %v419_v6 = vadd.f32 %v951_v5, %v794_v26  ;;  %v383_v7 = vpop.f32.mrb[13].mxu0 }
 0x113   :  { %v417_v8 = vadd.f32 %v794_v26, %v383_v7  ;;  %v952_v9 = vpop.f32.mrb[14].mxu0  ;;  %977 = vmatprep.mubr.bf16.mxu1 %v441_v4 }
 0x114   :  { %v420_v10 = vadd.f32 %v952_v9, %v794_v26  ;;  %v386_v11 = vpop.f32.mrb[15].mxu0  ;;  %978 = vmatmul.mubr.bf16.gmra.mrb[8].mxu1 %v442_v3  ;;  %v435_v13 = vmax.f32 %v419_v6, 0.0 }
 0x115   :  { %v418_v12 = vadd.f32 %v794_v26, %v386_v11  ;;  %v433_v15 = vmax.f32 %v417_v8, 0.0 }
 0x116   :  { %v436_v14 = vmax.f32 %v420_v10, 0.0 }
 0x117   :  { %v434_v16 = vmax.f32 %v418_v12, 0.0 }
 0x118   :  { %v444_v17 = vpack.c.bf16 %v436_v14, %v435_v13 }
 0x119   :  { %v443_v18 = vpack.c.bf16 %v434_v16, %v433_v15 }
 0x11b   :  { %981 = vmatprep.mubr.bf16.mxu1 %v443_v18 }
 0x11c   :  { %982 = vmatmul.mubr.bf16.gmra.mrb[12].mxu1 %v444_v17 }
 0x1d7   :  { %v971_v20 = vpop.f32.mrb[0].mxu1 }
 0x1d8   :  { %v550_v21 = vpop.f32.mrb[1].mxu1 }
 0x1d9   :  { %v551_v22 = vadd.f32 %v795_v19, %v550_v21  ;;  %v972_v23 = vpop.f32.mrb[2].mxu1 }
 0x1da   :  { %v553_v24 = vpop.f32.mrb[3].mxu1 }
 0x1db   :  { %v554_v25 = vadd.f32 %v795_v19, %v553_v24  ;;  %v613_v27 = vmax.f32 %v551_v22, 0.0 }
 0x1dd   :  { %v614_v26 = vmax.f32 %v554_v25, 0.0 }
 0x1df   :  { %v839_v28 = vpack.c.bf16 %v614_v26, %v613_v27  ;;  %v975_v29 = vpop.f32.mrb[4].mxu1 }
 0x1e0   :  { %v566_v30 = vpop.f32.mrb[5].mxu1 }
 0x1e1   :  { %840 = vst [vmem:[#allocation2] sm:$0xff] %v839_v28   ;;  %v976_v31 = vpop.f32.mrb[6].mxu1 }
 0x1e2   :  { %v569_v32 = vpop.f32.mrb[7].mxu1 }
 0x1e7   :  { %v979_v33 = vpop.f32.mrb[8].mxu1 }
 0x1e8   :  { %v726_v34 = vld [vmem:[#allocation2] sm:$0xff]   ;;  %v582_v35 = vpop.f32.mrb[9].mxu1 }
 0x1e9   :  { %727 = vst [vmem:[%s1177_s7] sm:$0xff] %v726_v34   ;;  %v980_v36 = vpop.f32.mrb[10].mxu1 }
 0x1ea   :  { %v585_v37 = vpop.f32.mrb[11].mxu1 }
 0x1ef   :  { %v983_v38 = vpop.f32.mrb[12].mxu1 }
 0x1f0   :  { %v598_v39 = vpop.f32.mrb[13].mxu1 }
 0x1f1   :  { %v984_v40 = vpop.f32.mrb[14].mxu1 }
 0x1f2   :  { %v601_v41 = vpop.f32.mrb[15].mxu1 }

// kernel: _compare_forward_impl.3
= control target key start
LH: loop header
LB: loop body
LE: loop exit
PB: predicated region body
PF: predicated region fallthrough
CT: control target
= control target key end

     0   :  { %vm109_vm0 = vcmask 130048   ;;  %s1177_s0 = inlined_call_operand.vmem [shape: bf16[24,16], index: 0, kind: input, shape index: {}]   ;;  %s1178_s1 = inlined_call_operand.vmem [shape: bf16[24,16], index: 1, kind: input, shape index: {}]   ;;  %s1179_s2 = inlined_call_operand.vmem [shape: bf16[16,128], index: 2, kind: input, shape index: {}]   ;;  %s1180_s3 = inlined_call_operand.vmem [shape: bf16[16,128], index: 3, kind: input, shape index: {}]   ;;  %s1181_s4 = inlined_call_operand.vmem [shape: f32[1,128], index: 4, kind: input, shape index: {}]   ;;  %s1182_s5 = inlined_call_operand.vmem [shape: bf16[128,128], index: 5, kind: input, shape index: {}]   ;;  %s1183_s6 = inlined_call_operand.vmem [shape: f32[1,128], index: 6, kind: input, shape index: {}]   ;;  %s1184_s7 = inlined_call_operand.vmem [shape: bf16[24,128], index: 7, kind: output, shape index: {}]  }
   0x1   :  { %v1005_v0 = vld [vmem:[%s1180_s3] sm:$0xff]   ;;  %v1007_v2 = vld [vmem:[%s1178_s1 + $0x8] sm:$0xff]   ;;  %v1009_v4 = vld [vmem:[%s1178_s1 + $0x10] sm:$0xff]  }
   0x2   :  { %v1006_v1 = vld [vmem:[%s1178_s1] sm:$0xff]   ;;  %921 = vmatprep.subr.bf16.mxu0 %v1005_v0  ;;  %v1010_v5 = vld [vmem:[%s1178_s1 + $0x18] sm:$0xff]   ;;  %v1012_v7 = vld [vmem:[%s1178_s1 + $0x28] sm:$0xff]  }
   0x3   :  { %922 = vmatpush3.bf16.msra.mxu0 %v1005_v0  ;;  %923 = vmatprep.mubr.msk.bf16.mxu0 %vm109_vm0, %v1006_v1  ;;  %v1008_v3 = vld [vmem:[%s1179_s2] sm:$0xff]   ;;  %v1013_v8 = vld [vmem:[%s1178_s1 + $0x30] sm:$0xff]   ;;  %v1024_v10 = vld [vmem:[%s1182_s5 + $0x8] sm:$0xff]  }
   0x4   :  { %939 = vmatprep.subr.bf16.mxu0 %v1008_v3  ;;  %v1011_v6 = vld [vmem:[%s1178_s1 + $0x20] sm:$0xff]   ;;  %v1025_v11 = vld [vmem:[%s1182_s5 + $0x10] sm:$0xff]   ;;  %v1014_v12 = vld [vmem:[%s1178_s1 + $0x38] sm:$0xff]  }
   0x5   :  { %v1023_v9 = vld [vmem:[%s1182_s5] sm:$0xff]   ;;  %v1026_v13 = vld [vmem:[%s1182_s5 + $0x18] sm:$0xff]   ;;  %v1016_v16 = vld [vmem:[%s1177_s0 + $0x8] sm:$0xff]  }
   0x6   :  { %924 = vmatmul.mubr.msk.bf16.vlgmr.msra.gmra.mrb[0].mxu0 %vm109_vm0, %v1007_v2  ;;  %957 = vmatprep.subr.bf16.mxu1 %v1023_v9  ;;  %v1015_v14 = vld [vmem:[%s1177_s0] sm:$0xff]   ;;  %v1028_v17 = vld [vmem:[%s1182_s5 + $0x28] sm:$0xff]   ;;  %v1017_v18 = vld [vmem:[%s1177_s0 + $0x10] sm:$0xff]  }
   0x7   :  { %940 = vmatpush3.bf16.msra.mxu0 %v1008_v3  ;;  %927 = vmatprep.mubr.msk.bf16.mxu0 %vm109_vm0, %v1009_v4  ;;  %v1027_v15 = vld [vmem:[%s1182_s5 + $0x20] sm:$0xff]   ;;  %v1018_v19 = vld [vmem:[%s1177_s0 + $0x18] sm:$0xff]   ;;  %v1020_v21 = vld [vmem:[%s1177_s0 + $0x28] sm:$0xff]  }
   0x8   :  { %958 = vmatpush3.bf16.msra.mxu1 %v1023_v9  ;;  %v1019_v20 = vld [vmem:[%s1177_s0 + $0x20] sm:$0xff]   ;;  %v1021_v22 = vld [vmem:[%s1177_s0 + $0x30] sm:$0xff]   ;;  %v1022_v23 = vld [vmem:[%s1177_s0 + $0x38] sm:$0xff]  }
   0x9   :  { %959 = vmatprep.subr.bf16.mxu1 %v1024_v10  ;;  %v1029_v24 = vld [vmem:[%s1182_s5 + $0x30] sm:$0xff]   ;;  %v1030_v25 = vld [vmem:[%s1182_s5 + $0x38] sm:$0xff]   ;;  %v798_v26 = vld [vmem:[%s1181_s4] ss:$0 sm:$0xff] }
   0xc   :  { %960 = vmatpush3.bf16.msra.mxu1 %v1024_v10 }
   0xd   :  { %961 = vmatprep.subr.bf16.mxu1 %v1025_v11 }
   0xe   :  { %928 = vmatmul.mubr.msk.bf16.gmra.mrb[4].mxu0 %vm109_vm0, %v1010_v5 }
   0xf   :  { %931 = vmatprep.mubr.msk.bf16.mxu0 %vm109_vm0, %v1011_v6 }
  0x10   :  { %962 = vmatpush3.bf16.msra.mxu1 %v1025_v11 }
  0x11   :  { %963 = vmatprep.subr.bf16.mxu1 %v1026_v13 }
  0x14   :  { %964 = vmatpush3.bf16.msra.mxu1 %v1026_v13 }
  0x15   :  { %965 = vmatprep.subr.bf16.mxu1 %v1027_v15 }
  0x16   :  { %932 = vmatmul.mubr.msk.bf16.gmra.mrb[8].mxu0 %vm109_vm0, %v1012_v7 }
  0x17   :  { %935 = vmatprep.mubr.msk.bf16.mxu0 %vm109_vm0, %v1013_v8 }
  0x18   :  { %966 = vmatpush3.bf16.msra.mxu1 %v1027_v15 }
  0x19   :  { %967 = vmatprep.subr.bf16.mxu1 %v1028_v17 }
  0x1c   :  { %968 = vmatpush3.bf16.msra.mxu1 %v1028_v17 }
  0x1d   :  { %969 = vmatprep.subr.bf16.mxu1 %v1029_v24 }
  0x1e   :  { %936 = vmatmul.mubr.msk.bf16.gmra.mrb[12].mxu0 %vm109_vm0, %v1014_v12 }
  0x1f   :  { %941 = vmatprep.mubr.msk.bf16.mxu0 %vm109_vm0, %v1015_v14 }
  0x20   :  { %970 = vmatpush3.bf16.msra.mxu1 %v1029_v24 }
  0x21   :  { %971 = vmatprep.subr.bf16.mxu1 %v1030_v25 }
  0x24   :  { %972 = vmatpush3.bf16.msra.mxu1 %v1030_v25 }
  0x26   :  { %942 = vmatmul.mubr.msk.bf16.vlgmr.msra.gmra.mrb[0].mxu0 %vm109_vm0, %v1016_v16 }
  0x27   :  { %945 = vmatprep.mubr.msk.bf16.mxu0 %vm109_vm0, %v1017_v18 }
  0x2e   :  { %946 = vmatmul.mubr.msk.bf16.gmra.mrb[4].mxu0 %vm109_vm0, %v1018_v19  ;;  %v799_v19 = vld [vmem:[%s1183_s6] ss:$0 sm:$0xff] }
  0x2f   :  { %949 = vmatprep.mubr.msk.bf16.mxu0 %vm109_vm0, %v1019_v20 }
  0x36   :  { %950 = vmatmul.mubr.msk.bf16.gmra.mrb[8].mxu0 %vm109_vm0, %v1020_v21 }
  0x37   :  { %953 = vmatprep.mubr.msk.bf16.mxu0 %vm109_vm0, %v1021_v22 }
  0x3e   :  { %954 = vmatmul.mubr.msk.bf16.gmra.mrb[12].mxu0 %vm109_vm0, %v1022_v23 }
  0xf9   :  { %v943_v27 = vpop.f32.mrb[0].mxu0 }
  0xfa   :  { %v407_v28 = vadd.f32 %v943_v27, %v798_v26  ;;  %v335_v29 = vpop.f32.mrb[1].mxu0 }
  0xfb   :  { %v405_v30 = vadd.f32 %v798_v26, %v335_v29  ;;  %v944_v31 = vpop.f32.mrb[2].mxu0 }
  0xfc   :  { %v408_v32 = vadd.f32 %v944_v31, %v798_v26  ;;  %v338_v33 = vpop.f32.mrb[3].mxu0  ;;  %v423_v35 = vmax.f32 %v407_v28, 0.0 }
  0xfd   :  { %v406_v34 = vadd.f32 %v798_v26, %v338_v33  ;;  %v421_v37 = vmax.f32 %v405_v30, 0.0 }
  0xfe   :  { %v424_v36 = vmax.f32 %v408_v32, 0.0 }
  0xff   :  { %v422_v38 = vmax.f32 %v406_v34, 0.0 }
 0x100   :  { %v438_v39 = vpack.c.bf16 %v424_v36, %v423_v35 }
 0x101   :  { %v947_v40 = vpop.f32.mrb[4].mxu0  ;;  %v437_v41 = vpack.c.bf16 %v422_v38, %v421_v37 }
 0x102   :  { %v411_v42 = vadd.f32 %v947_v40, %v798_v26  ;;  %v351_v43 = vpop.f32.mrb[5].mxu0 }
 0x103   :  { %v409_v44 = vadd.f32 %v798_v26, %v351_v43  ;;  %v948_v45 = vpop.f32.mrb[6].mxu0  ;;  %973 = vmatprep.mubr.bf16.mxu1 %v437_v41 }
 0x104   :  { %v412_v46 = vadd.f32 %v948_v45, %v798_v26  ;;  %v354_v47 = vpop.f32.mrb[7].mxu0  ;;  %974 = vmatmul.mubr.bf16.vlgmr.msra.gmra.mrb[0].mxu1 %v438_v39  ;;  %v427_v49 = vmax.f32 %v411_v42, 0.0 }
 0x105   :  { %v410_v48 = vadd.f32 %v798_v26, %v354_v47  ;;  %v425_v51 = vmax.f32 %v409_v44, 0.0 }
 0x106   :  { %v428_v50 = vmax.f32 %v412_v46, 0.0 }
 0x107   :  { %v426_v52 = vmax.f32 %v410_v48, 0.0 }
 0x108   :  { %v440_v53 = vpack.c.bf16 %v428_v50, %v427_v49 }
 0x109   :  { %v439_v54 = vpack.c.bf16 %v426_v52, %v425_v51  ;;  %v951_v55 = vpop.f32.mrb[8].mxu0 }
 0x10a   :  { %v415_v56 = vadd.f32 %v951_v55, %v798_v26  ;;  %v367_v57 = vpop.f32.mrb[9].mxu0 }
 0x10b   :  { %v413_v58 = vadd.f32 %v798_v26, %v367_v57  ;;  %v952_v59 = vpop.f32.mrb[10].mxu0  ;;  %977 = vmatprep.mubr.bf16.mxu1 %v439_v54 }
 0x10c   :  { %v416_v60 = vadd.f32 %v952_v59, %v798_v26  ;;  %v370_v61 = vpop.f32.mrb[11].mxu0  ;;  %978 = vmatmul.mubr.bf16.gmra.mrb[4].mxu1 %v440_v53  ;;  %v431_v63 = vmax.f32 %v415_v56, 0.0 }
 0x10d   :  { %v414_v62 = vadd.f32 %v798_v26, %v370_v61  ;;  %v429_v1 = vmax.f32 %v413_v58, 0.0 }
 0x10e   :  { %v432_v0 = vmax.f32 %v416_v60, 0.0 }
 0x10f   :  { %v430_v2 = vmax.f32 %v414_v62, 0.0 }
 0x110   :  { %v442_v3 = vpack.c.bf16 %v432_v0, %v431_v63 }
 0x111   :  { %v441_v4 = vpack.c.bf16 %v430_v2, %v429_v1  ;;  %v955_v5 = vpop.f32.mrb[12].mxu0 }
 0x112   :  { %v419_v6 = vadd.f32 %v955_v5, %v798_v26  ;;  %v383_v7 = vpop.f32.mrb[13].mxu0 }
 0x113   :  { %v417_v8 = vadd.f32 %v798_v26, %v383_v7  ;;  %v956_v9 = vpop.f32.mrb[14].mxu0  ;;  %981 = vmatprep.mubr.bf16.mxu1 %v441_v4 }
 0x114   :  { %v420_v10 = vadd.f32 %v956_v9, %v798_v26  ;;  %v386_v11 = vpop.f32.mrb[15].mxu0  ;;  %982 = vmatmul.mubr.bf16.gmra.mrb[8].mxu1 %v442_v3  ;;  %v435_v13 = vmax.f32 %v419_v6, 0.0 }
 0x115   :  { %v418_v12 = vadd.f32 %v798_v26, %v386_v11  ;;  %v433_v15 = vmax.f32 %v417_v8, 0.0 }
 0x116   :  { %v436_v14 = vmax.f32 %v420_v10, 0.0 }
 0x117   :  { %v434_v16 = vmax.f32 %v418_v12, 0.0 }
 0x118   :  { %v444_v17 = vpack.c.bf16 %v436_v14, %v435_v13 }
 0x119   :  { %v443_v18 = vpack.c.bf16 %v434_v16, %v433_v15 }
 0x11b   :  { %985 = vmatprep.mubr.bf16.mxu1 %v443_v18 }
 0x11c   :  { %986 = vmatmul.mubr.bf16.gmra.mrb[12].mxu1 %v444_v17 }
 0x1d7   :  { %v975_v20 = vpop.f32.mrb[0].mxu1 }
 0x1d8   :  { %v559_v21 = vadd.f32 %v975_v20, %v799_v19  ;;  %v550_v22 = vpop.f32.mrb[1].mxu1 }
 0x1d9   :  { %v551_v23 = vadd.f32 %v799_v19, %v550_v22  ;;  %v976_v24 = vpop.f32.mrb[2].mxu1 }
 0x1da   :  { %v562_v25 = vadd.f32 %v976_v24, %v799_v19  ;;  %v553_v27 = vpop.f32.mrb[3].mxu1  ;;  %v615_v28 = vmax.f32 %v559_v21, 0.0 }
 0x1db   :  { %v554_v26 = vadd.f32 %v799_v19, %v553_v27  ;;  %v613_v30 = vmax.f32 %v551_v23, 0.0 }
 0x1dc   :  { %v616_v29 = vmax.f32 %v562_v25, 0.0 }
 0x1dd   :  { %v614_v31 = vmax.f32 %v554_v26, 0.0 }
 0x1de   :  { %v848_v32 = vpack.c.bf16 %v616_v29, %v615_v28 }
 0x1df   :  { %v843_v33 = vpack.c.bf16 %v614_v31, %v613_v30  ;;  %v979_v34 = vpop.f32.mrb[4].mxu1 }
 0x1e0   :  { %880 = vst [vmem:[#allocation2 + $0x8] sm:$0xff] %v848_v32   ;;  %v566_v35 = vpop.f32.mrb[5].mxu1 }
 0x1e1   :  { %844 = vst [vmem:[#allocation2] sm:$0xff] %v843_v33   ;;  %v980_v36 = vpop.f32.mrb[6].mxu1 }
 0x1e2   :  { %v569_v37 = vpop.f32.mrb[7].mxu1 }
 0x1e7   :  { %v730_v38 = vld [vmem:[#allocation2 + $0x8] sm:$0xf]  ;;  %v983_v39 = vpop.f32.mrb[8].mxu1 }
 0x1e8   :  { %731 = vst [vmem:[%s1184_s7 + $0x8] sm:$0xf] %v730_v38  ;;  %v726_v40 = vld [vmem:[#allocation2] sm:$0xff]   ;;  %v582_v41 = vpop.f32.mrb[9].mxu1 }
 0x1e9   :  { %727 = vst [vmem:[%s1184_s7] sm:$0xff] %v726_v40   ;;  %v984_v42 = vpop.f32.mrb[10].mxu1 }
 0x1ea   :  { %v585_v43 = vpop.f32.mrb[11].mxu1 }
 0x1ef   :  { %v987_v44 = vpop.f32.mrb[12].mxu1 }
 0x1f0   :  { %v598_v45 = vpop.f32.mrb[13].mxu1 }
 0x1f1   :  { %v988_v46 = vpop.f32.mrb[14].mxu1 }
 0x1f2   :  { %v601_v47 = vpop.f32.mrb[15].mxu1 }

</bundles_post_ra>
